<compile_context>
chip_gen: v5e
topology: v5e:2x2
jax: 0.10.0
libtpu: 0.0.40
codegen_flags: <defaults>
</compile_context>

<pallas_src>
import functools
import math

import jax
import jax.numpy as jnp
from jax import lax
from jax.experimental import pallas as pl
from jax.experimental.pallas import tpu as pltpu


# ---------------------------------------------------------------------------
# Path A: small table — whole table resident in VMEM, indices in SMEM,
#         N unrolled exact row loads; scale fused into the store.
# ---------------------------------------------------------------------------
def _vmem_gather_kernel(idx_ref, w_ref, o_ref, *, scale):
    """idx_ref: (N,) int32 in SMEM.  w_ref: (V, D) f32 VMEM.  o_ref: (N, D)."""
    n = o_ref.shape[0]

    def body(i, carry):
        row_idx = idx_ref[i]                            # scalar read from SMEM
        row = w_ref[pl.ds(row_idx, 1), :]               # (1, D) dynamic row load
        o_ref[pl.ds(i, 1), :] = row * scale             # fused scale, lane-dense store
        return carry

    lax.fori_loop(0, n, body, None, unroll=True)


def _vmem_gather(idx_flat, weight, scale):
    n = idx_flat.shape[0]
    v, d = weight.shape
    kern = functools.partial(_vmem_gather_kernel, scale=float(scale))
    return pl.pallas_call(
        kern,
        out_shape=jax.ShapeDtypeStruct((n, d), jnp.float32),
        in_specs=[pl.BlockSpec(memory_space=pltpu.MemorySpace.SMEM),   # indices
                  pl.BlockSpec(memory_space=pltpu.MemorySpace.VMEM)],  # full table
        out_specs=pl.BlockSpec(memory_space=pltpu.MemorySpace.VMEM),
        cost_estimate=pl.CostEstimate(flops=n * d,
                                      transcendentals=0,
                                      bytes_accessed=(v * d + n * d) * 4 + n * 4),
    )(idx_flat, weight)


# ---------------------------------------------------------------------------
# Path B: large table — table stays in HBM; gather only the N needed rows with
#         overlapped per-row async DMAs into a VMEM scratch, then scale+store.
# ---------------------------------------------------------------------------
def _dma_gather_kernel(idx_ref, w_hbm_ref, o_ref, rows_vmem, sems, *, scale):
    """idx_ref: (N,) int32 SMEM.  w_hbm_ref: (V, D) f32 raw HBM ref.
    o_ref: (N, D) VMEM output.  rows_vmem/sems: (N, D) scratch + N DMA sems."""
    n = o_ref.shape[0]
    # Issue all N row DMAs first so they overlap, then wait.
    for i in range(n):
        row = idx_ref[i]
        pltpu.make_async_copy(
            w_hbm_ref.at[pl.ds(row, 1), :],
            rows_vmem.at[pl.ds(i, 1), :],
            sems.at[i],
        ).start()
    for i in range(n):
        pltpu.make_async_copy(
            w_hbm_ref.at[pl.ds(0, 1), :],     # shape-only; completion is sems[i]
            rows_vmem.at[pl.ds(i, 1), :],
            sems.at[i],
        ).wait()
    o_ref[...] = rows_vmem[...] * scale


def _dma_gather(idx_flat, weight, scale):
    n = idx_flat.shape[0]
    v, d = weight.shape
    del v  # table never copied whole
    kern = functools.partial(_dma_gather_kernel, scale=float(scale))
    return pl.pallas_call(
        kern,
        out_shape=jax.ShapeDtypeStruct((n, d), jnp.float32),
        in_specs=[pl.BlockSpec(memory_space=pltpu.MemorySpace.SMEM),   # indices
                  pl.BlockSpec(memory_space=pl.ANY)],                  # table in HBM
        out_specs=pl.BlockSpec(memory_space=pltpu.MemorySpace.VMEM),
        scratch_shapes=[pltpu.VMEM((n, d), jnp.float32),
                        pltpu.SemaphoreType.DMA((n,))],
        cost_estimate=pl.CostEstimate(flops=n * d,
                                      transcendentals=0,
                                      bytes_accessed=2 * n * d * 4 + n * 4),
    )(idx_flat, weight)


# ------------------------------ JAX wrapper --------------------------------
def init_scaled_embedding_weight(key, num_embeddings, embedding_dim,
                                 scale=10.0, smooth=True):
    """Reproduces ScaledEmbedding.__init__: N(0,1) init, optional cumsum
    smoothing, then divide by `scale` (forward multiplies it back)."""
    w = jax.random.normal(key, (num_embeddings, embedding_dim),
                          dtype=jnp.float32)
    if smooth:
        w = jnp.cumsum(w, axis=0)
        w = w / jnp.sqrt(
            jnp.arange(1, num_embeddings + 1, dtype=jnp.float32))[:, None]
    return w / scale


def _vmem_table_budget_bytes():
    # Keep the whole table VMEM-resident only while it is a small fraction of
    # VMEM (v7x has half the VMEM of v5e/v6e); beyond that, DMA-gather rows.
    try:
        return int(pltpu.get_tpu_info().vmem_capacity_bytes) // 16
    except Exception:
        return 4 << 20


def scaled_embedding_forward(indices, weight, *, scale, force_dma_gather=False):
    """forward(x) = embedding(x) * scale, for integer indices of any shape."""
    orig_shape = indices.shape
    n = math.prod(orig_shape)
    v, d = weight.shape
    # Clamp so dynamic row addressing can never go out of bounds.
    idx_flat = jnp.clip(indices.reshape(n).astype(jnp.int32), 0, v - 1)

    table_bytes = v * d * weight.dtype.itemsize
    if force_dma_gather or table_bytes > _vmem_table_budget_bytes():
        out = _dma_gather(idx_flat, weight, scale)
    else:
        out = _vmem_gather(idx_flat, weight, scale)
    # TODO(synk): for very large N (serving/training batches), add a token-axis
    # grid with dimension_semantics=("parallel",) to use both v7x TensorCores.
    return out.reshape(*orig_shape, d)


# --------------------------------- main ------------------------------------
if __name__ == "__main__":
    NUM_EMBEDDINGS = 512
    EMBEDDING_DIM = 128      # lane-dense (multiple of 128)
    SCALE = 10.0
    B, S = 2, 8

    key = jax.random.PRNGKey(0)
    wkey, xkey = jax.random.split(key)

    weight = init_scaled_embedding_weight(
        wkey, NUM_EMBEDDINGS, EMBEDDING_DIM, scale=SCALE, smooth=True)
    idx = jax.random.randint(xkey, (B, S), 0, NUM_EMBEDDINGS, dtype=jnp.int32)

    # Reference: plain-JAX embedding lookup * scale.
    ref = weight[idx] * SCALE

    # Path A: whole-table-VMEM, SMEM-indexed unrolled row-load gather.
    fwd = jax.jit(functools.partial(scaled_embedding_forward, scale=SCALE))
    out = jax.block_until_ready(fwd(idx, weight))
    assert out.shape == (B, S, EMBEDDING_DIM), out.shape
    assert bool(jnp.all(jnp.isfinite(out)))
    assert bool(jnp.allclose(out, ref, atol=1e-5, rtol=1e-5)), "VMEM path mismatch"

    # Path B: HBM-resident table + per-row DMA gather (the large-table path),
    # exercised here at small size purely to verify it end-to-end.
    fwd_dma = jax.jit(functools.partial(
        scaled_embedding_forward, scale=SCALE, force_dma_gather=True))
    out_dma = jax.block_until_ready(fwd_dma(idx, weight))
    assert bool(jnp.allclose(out_dma, ref, atol=1e-5, rtol=1e-5)), "DMA path mismatch"

    print("KERNEL_OK")
</pallas_src>

<mosaic_0001>
module attributes {stable_mosaic.version = 11 : i64} {
  func.func @_vmem_gather_kernel(%arg0: memref<16xi32, #tpu.memory_space<smem>>, %arg1: memref<512x128xf32, #tpu.memory_space<vmem>>, %arg2: memref<16x128xf32, #tpu.memory_space<vmem>>) attributes {dimension_semantics = [], scalar_prefetch = 0 : i64, scratch_operands = 0 : i64, tpu.core_type = #tpu.core_type<tc>} {
    %c0_i32 = arith.constant 0 : i32
    %0 = arith.index_cast %c0_i32 : i32 to index
    %1 = memref.load %arg0[%0] : memref<16xi32, #tpu.memory_space<smem>>
    %2 = arith.index_cast %1 : i32 to index
    %c0 = arith.constant 0 : index
    %3 = vector.load %arg1[%2, %c0] : memref<512x128xf32, #tpu.memory_space<vmem>>, vector<1x128xf32>
    %cst = arith.constant 1.000000e+01 : f32
    %4 = vector.broadcast %cst : f32 to vector<1x128xf32>
    %5 = arith.mulf %3, %4 : vector<1x128xf32>
    %6 = arith.index_cast %c0_i32 : i32 to index
    %c0_0 = arith.constant 0 : index
    %7 = vector.load %arg2[%6, %c0_0] : memref<16x128xf32, #tpu.memory_space<vmem>>, vector<1x128xf32>
    tpu.vector_store %arg2[%6, %c0_0], %5 {strides = array<i32>} : memref<16x128xf32, #tpu.memory_space<vmem>>, vector<1x128xf32>,
    %c1_i32 = arith.constant 1 : i32
    %8 = arith.index_cast %c1_i32 : i32 to index
    %9 = memref.load %arg0[%8] : memref<16xi32, #tpu.memory_space<smem>>
    %10 = arith.index_cast %9 : i32 to index
    %c0_1 = arith.constant 0 : index
    %11 = vector.load %arg1[%10, %c0_1] : memref<512x128xf32, #tpu.memory_space<vmem>>, vector<1x128xf32>
    %cst_2 = arith.constant 1.000000e+01 : f32
    %12 = vector.broadcast %cst_2 : f32 to vector<1x128xf32>
    %13 = arith.mulf %11, %12 : vector<1x128xf32>
    %14 = arith.index_cast %c1_i32 : i32 to index
    %c0_3 = arith.constant 0 : index
    %15 = vector.load %arg2[%14, %c0_3] : memref<16x128xf32, #tpu.memory_space<vmem>>, vector<1x128xf32>
    tpu.vector_store %arg2[%14, %c0_3], %13 {strides = array<i32>} : memref<16x128xf32, #tpu.memory_space<vmem>>, vector<1x128xf32>,
    %c2_i32 = arith.constant 2 : i32
    %16 = arith.index_cast %c2_i32 : i32 to index
    %17 = memref.load %arg0[%16] : memref<16xi32, #tpu.memory_space<smem>>
    %18 = arith.index_cast %17 : i32 to index
    %c0_4 = arith.constant 0 : index
    %19 = vector.load %arg1[%18, %c0_4] : memref<512x128xf32, #tpu.memory_space<vmem>>, vector<1x128xf32>
    %cst_5 = arith.constant 1.000000e+01 : f32
    %20 = vector.broadcast %cst_5 : f32 to vector<1x128xf32>
    %21 = arith.mulf %19, %20 : vector<1x128xf32>
    %22 = arith.index_cast %c2_i32 : i32 to index
    %c0_6 = arith.constant 0 : index
    %23 = vector.load %arg2[%22, %c0_6] : memref<16x128xf32, #tpu.memory_space<vmem>>, vector<1x128xf32>
    tpu.vector_store %arg2[%22, %c0_6], %21 {strides = array<i32>} : memref<16x128xf32, #tpu.memory_space<vmem>>, vector<1x128xf32>,
    %c3_i32 = arith.constant 3 : i32
    %24 = arith.index_cast %c3_i32 : i32 to index
    %25 = memref.load %arg0[%24] : memref<16xi32, #tpu.memory_space<smem>>
    %26 = arith.index_cast %25 : i32 to index
    %c0_7 = arith.constant 0 : index
    %27 = vector.load %arg1[%26, %c0_7] : memref<512x128xf32, #tpu.memory_space<vmem>>, vector<1x128xf32>
    %cst_8 = arith.constant 1.000000e+01 : f32
    %28 = vector.broadcast %cst_8 : f32 to vector<1x128xf32>
    %29 = arith.mulf %27, %28 : vector<1x128xf32>
    %30 = arith.index_cast %c3_i32 : i32 to index
    %c0_9 = arith.constant 0 : index
    %31 = vector.load %arg2[%30, %c0_9] : memref<16x128xf32, #tpu.memory_space<vmem>>, vector<1x128xf32>
    tpu.vector_store %arg2[%30, %c0_9], %29 {strides = array<i32>} : memref<16x128xf32, #tpu.memory_space<vmem>>, vector<1x128xf32>,
    %c4_i32 = arith.constant 4 : i32
    %32 = arith.index_cast %c4_i32 : i32 to index
    %33 = memref.load %arg0[%32] : memref<16xi32, #tpu.memory_space<smem>>
    %34 = arith.index_cast %33 : i32 to index
    %c0_10 = arith.constant 0 : index
    %35 = vector.load %arg1[%34, %c0_10] : memref<512x128xf32, #tpu.memory_space<vmem>>, vector<1x128xf32>
    %cst_11 = arith.constant 1.000000e+01 : f32
    %36 = vector.broadcast %cst_11 : f32 to vector<1x128xf32>
    %37 = arith.mulf %35, %36 : vector<1x128xf32>
    %38 = arith.index_cast %c4_i32 : i32 to index
    %c0_12 = arith.constant 0 : index
    %39 = vector.load %arg2[%38, %c0_12] : memref<16x128xf32, #tpu.memory_space<vmem>>, vector<1x128xf32>
    tpu.vector_store %arg2[%38, %c0_12], %37 {strides = array<i32>} : memref<16x128xf32, #tpu.memory_space<vmem>>, vector<1x128xf32>,
    %c5_i32 = arith.constant 5 : i32
    %40 = arith.index_cast %c5_i32 : i32 to index
    %41 = memref.load %arg0[%40] : memref<16xi32, #tpu.memory_space<smem>>
    %42 = arith.index_cast %41 : i32 to index
    %c0_13 = arith.constant 0 : index
    %43 = vector.load %arg1[%42, %c0_13] : memref<512x128xf32, #tpu.memory_space<vmem>>, vector<1x128xf32>
    %cst_14 = arith.constant 1.000000e+01 : f32
    %44 = vector.broadcast %cst_14 : f32 to vector<1x128xf32>
    %45 = arith.mulf %43, %44 : vector<1x128xf32>
    %46 = arith.index_cast %c5_i32 : i32 to index
    %c0_15 = arith.constant 0 : index
    %47 = vector.load %arg2[%46, %c0_15] : memref<16x128xf32, #tpu.memory_space<vmem>>, vector<1x128xf32>
    tpu.vector_store %arg2[%46, %c0_15], %45 {strides = array<i32>} : memref<16x128xf32, #tpu.memory_space<vmem>>, vector<1x128xf32>,
    %c6_i32 = arith.constant 6 : i32
    %48 = arith.index_cast %c6_i32 : i32 to index
    %49 = memref.load %arg0[%48] : memref<16xi32, #tpu.memory_space<smem>>
    %50 = arith.index_cast %49 : i32 to index
    %c0_16 = arith.constant 0 : index
    %51 = vector.load %arg1[%50, %c0_16] : memref<512x128xf32, #tpu.memory_space<vmem>>, vector<1x128xf32>
    %cst_17 = arith.constant 1.000000e+01 : f32
    %52 = vector.broadcast %cst_17 : f32 to vector<1x128xf32>
    %53 = arith.mulf %51, %52 : vector<1x128xf32>
    %54 = arith.index_cast %c6_i32 : i32 to index
    %c0_18 = arith.constant 0 : index
    %55 = vector.load %arg2[%54, %c0_18] : memref<16x128xf32, #tpu.memory_space<vmem>>, vector<1x128xf32>
    tpu.vector_store %arg2[%54, %c0_18], %53 {strides = array<i32>} : memref<16x128xf32, #tpu.memory_space<vmem>>, vector<1x128xf32>,
    %c7_i32 = arith.constant 7 : i32
    %56 = arith.index_cast %c7_i32 : i32 to index
    %57 = memref.load %arg0[%56] : memref<16xi32, #tpu.memory_space<smem>>
    %58 = arith.index_cast %57 : i32 to index
    %c0_19 = arith.constant 0 : index
    %59 = vector.load %arg1[%58, %c0_19] : memref<512x128xf32, #tpu.memory_space<vmem>>, vector<1x128xf32>
    %cst_20 = arith.constant 1.000000e+01 : f32
    %60 = vector.broadcast %cst_20 : f32 to vector<1x128xf32>
    %61 = arith.mulf %59, %60 : vector<1x128xf32>
    %62 = arith.index_cast %c7_i32 : i32 to index
    %c0_21 = arith.constant 0 : index
    %63 = vector.load %arg2[%62, %c0_21] : memref<16x128xf32, #tpu.memory_space<vmem>>, vector<1x128xf32>
    tpu.vector_store %arg2[%62, %c0_21], %61 {strides = array<i32>} : memref<16x128xf32, #tpu.memory_space<vmem>>, vector<1x128xf32>,
    %c8_i32 = arith.constant 8 : i32
    %64 = arith.index_cast %c8_i32 : i32 to index
    %65 = memref.load %arg0[%64] : memref<16xi32, #tpu.memory_space<smem>>
    %66 = arith.index_cast %65 : i32 to index
    %c0_22 = arith.constant 0 : index
    %67 = vector.load %arg1[%66, %c0_22] : memref<512x128xf32, #tpu.memory_space<vmem>>, vector<1x128xf32>
    %cst_23 = arith.constant 1.000000e+01 : f32
    %68 = vector.broadcast %cst_23 : f32 to vector<1x128xf32>
    %69 = arith.mulf %67, %68 : vector<1x128xf32>
    %70 = arith.index_cast %c8_i32 : i32 to index
    %c0_24 = arith.constant 0 : index
    %71 = vector.load %arg2[%70, %c0_24] : memref<16x128xf32, #tpu.memory_space<vmem>>, vector<1x128xf32>
    tpu.vector_store %arg2[%70, %c0_24], %69 {strides = array<i32>} : memref<16x128xf32, #tpu.memory_space<vmem>>, vector<1x128xf32>,
    %c9_i32 = arith.constant 9 : i32
    %72 = arith.index_cast %c9_i32 : i32 to index
    %73 = memref.load %arg0[%72] : memref<16xi32, #tpu.memory_space<smem>>
    %74 = arith.index_cast %73 : i32 to index
    %c0_25 = arith.constant 0 : index
    %75 = vector.load %arg1[%74, %c0_25] : memref<512x128xf32, #tpu.memory_space<vmem>>, vector<1x128xf32>
    %cst_26 = arith.constant 1.000000e+01 : f32
    %76 = vector.broadcast %cst_26 : f32 to vector<1x128xf32>
    %77 = arith.mulf %75, %76 : vector<1x128xf32>
    %78 = arith.index_cast %c9_i32 : i32 to index
    %c0_27 = arith.constant 0 : index
    %79 = vector.load %arg2[%78, %c0_27] : memref<16x128xf32, #tpu.memory_space<vmem>>, vector<1x128xf32>
    tpu.vector_store %arg2[%78, %c0_27], %77 {strides = array<i32>} : memref<16x128xf32, #tpu.memory_space<vmem>>, vector<1x128xf32>,
    %c10_i32 = arith.constant 10 : i32
    %80 = arith.index_cast %c10_i32 : i32 to index
    %81 = memref.load %arg0[%80] : memref<16xi32, #tpu.memory_space<smem>>
    %82 = arith.index_cast %81 : i32 to index
    %c0_28 = arith.constant 0 : index
    %83 = vector.load %arg1[%82, %c0_28] : memref<512x128xf32, #tpu.memory_space<vmem>>, vector<1x128xf32>
    %cst_29 = arith.constant 1.000000e+01 : f32
    %84 = vector.broadcast %cst_29 : f32 to vector<1x128xf32>
    %85 = arith.mulf %83, %84 : vector<1x128xf32>
    %86 = arith.index_cast %c10_i32 : i32 to index
    %c0_30 = arith.constant 0 : index
    %87 = vector.load %arg2[%86, %c0_30] : memref<16x128xf32, #tpu.memory_space<vmem>>, vector<1x128xf32>
    tpu.vector_store %arg2[%86, %c0_30], %85 {strides = array<i32>} : memref<16x128xf32, #tpu.memory_space<vmem>>, vector<1x128xf32>,
    %c11_i32 = arith.constant 11 : i32
    %88 = arith.index_cast %c11_i32 : i32 to index
    %89 = memref.load %arg0[%88] : memref<16xi32, #tpu.memory_space<smem>>
    %90 = arith.index_cast %89 : i32 to index
    %c0_31 = arith.constant 0 : index
    %91 = vector.load %arg1[%90, %c0_31] : memref<512x128xf32, #tpu.memory_space<vmem>>, vector<1x128xf32>
    %cst_32 = arith.constant 1.000000e+01 : f32
    %92 = vector.broadcast %cst_32 : f32 to vector<1x128xf32>
    %93 = arith.mulf %91, %92 : vector<1x128xf32>
    %94 = arith.index_cast %c11_i32 : i32 to index
    %c0_33 = arith.constant 0 : index
    %95 = vector.load %arg2[%94, %c0_33] : memref<16x128xf32, #tpu.memory_space<vmem>>, vector<1x128xf32>
    tpu.vector_store %arg2[%94, %c0_33], %93 {strides = array<i32>} : memref<16x128xf32, #tpu.memory_space<vmem>>, vector<1x128xf32>,
    %c12_i32 = arith.constant 12 : i32
    %96 = arith.index_cast %c12_i32 : i32 to index
    %97 = memref.load %arg0[%96] : memref<16xi32, #tpu.memory_space<smem>>
    %98 = arith.index_cast %97 : i32 to index
    %c0_34 = arith.constant 0 : index
    %99 = vector.load %arg1[%98, %c0_34] : memref<512x128xf32, #tpu.memory_space<vmem>>, vector<1x128xf32>
    %cst_35 = arith.constant 1.000000e+01 : f32
    %100 = vector.broadcast %cst_35 : f32 to vector<1x128xf32>
    %101 = arith.mulf %99, %100 : vector<1x128xf32>
    %102 = arith.index_cast %c12_i32 : i32 to index
    %c0_36 = arith.constant 0 : index
    %103 = vector.load %arg2[%102, %c0_36] : memref<16x128xf32, #tpu.memory_space<vmem>>, vector<1x128xf32>
    tpu.vector_store %arg2[%102, %c0_36], %101 {strides = array<i32>} : memref<16x128xf32, #tpu.memory_space<vmem>>, vector<1x128xf32>,
    %c13_i32 = arith.constant 13 : i32
    %104 = arith.index_cast %c13_i32 : i32 to index
    %105 = memref.load %arg0[%104] : memref<16xi32, #tpu.memory_space<smem>>
    %106 = arith.index_cast %105 : i32 to index
    %c0_37 = arith.constant 0 : index
    %107 = vector.load %arg1[%106, %c0_37] : memref<512x128xf32, #tpu.memory_space<vmem>>, vector<1x128xf32>
    %cst_38 = arith.constant 1.000000e+01 : f32
    %108 = vector.broadcast %cst_38 : f32 to vector<1x128xf32>
    %109 = arith.mulf %107, %108 : vector<1x128xf32>
    %110 = arith.index_cast %c13_i32 : i32 to index
    %c0_39 = arith.constant 0 : index
    %111 = vector.load %arg2[%110, %c0_39] : memref<16x128xf32, #tpu.memory_space<vmem>>, vector<1x128xf32>
    tpu.vector_store %arg2[%110, %c0_39], %109 {strides = array<i32>} : memref<16x128xf32, #tpu.memory_space<vmem>>, vector<1x128xf32>,
    %c14_i32 = arith.constant 14 : i32
    %112 = arith.index_cast %c14_i32 : i32 to index
    %113 = memref.load %arg0[%112] : memref<16xi32, #tpu.memory_space<smem>>
    %114 = arith.index_cast %113 : i32 to index
    %c0_40 = arith.constant 0 : index
    %115 = vector.load %arg1[%114, %c0_40] : memref<512x128xf32, #tpu.memory_space<vmem>>, vector<1x128xf32>
    %cst_41 = arith.constant 1.000000e+01 : f32
    %116 = vector.broadcast %cst_41 : f32 to vector<1x128xf32>
    %117 = arith.mulf %115, %116 : vector<1x128xf32>
    %118 = arith.index_cast %c14_i32 : i32 to index
    %c0_42 = arith.constant 0 : index
    %119 = vector.load %arg2[%118, %c0_42] : memref<16x128xf32, #tpu.memory_space<vmem>>, vector<1x128xf32>
    tpu.vector_store %arg2[%118, %c0_42], %117 {strides = array<i32>} : memref<16x128xf32, #tpu.memory_space<vmem>>, vector<1x128xf32>,
    %c15_i32 = arith.constant 15 : i32
    %120 = arith.index_cast %c15_i32 : i32 to index
    %121 = memref.load %arg0[%120] : memref<16xi32, #tpu.memory_space<smem>>
    %122 = arith.index_cast %121 : i32 to index
    %c0_43 = arith.constant 0 : index
    %123 = vector.load %arg1[%122, %c0_43] : memref<512x128xf32, #tpu.memory_space<vmem>>, vector<1x128xf32>
    %cst_44 = arith.constant 1.000000e+01 : f32
    %124 = vector.broadcast %cst_44 : f32 to vector<1x128xf32>
    %125 = arith.mulf %123, %124 : vector<1x128xf32>
    %126 = arith.index_cast %c15_i32 : i32 to index
    %c0_45 = arith.constant 0 : index
    %127 = vector.load %arg2[%126, %c0_45] : memref<16x128xf32, #tpu.memory_space<vmem>>, vector<1x128xf32>
    tpu.vector_store %arg2[%126, %c0_45], %125 {strides = array<i32>} : memref<16x128xf32, #tpu.memory_space<vmem>>, vector<1x128xf32>,
    %c16_i32 = arith.constant 16 : i32
    return
  }
}

</mosaic_0001>

<bundles_post_ra>
// kernel: scaled_embedding_forward.1
= control target key start
LH: loop header
LB: loop body
LE: loop exit
PB: predicated region body
PF: predicated region fallthrough
CT: control target
= control target key end

     0   :  { %7 = vsyncpa [#allocation5], 0  ;;  %s278_s0 = inlined_call_operand.vmem [shape: s32[16], index: 0, kind: input, shape index: {}]   ;;  %s279_s1 = inlined_call_operand.hbm [shape: f32[512,128], index: 1, kind: input, shape index: {}]   ;;  %s280_s2 = inlined_call_operand.hbm [shape: f32[16,128], index: 2, kind: output, shape index: {}]  }
   0x1   :  { %8 = vsyncpa [#allocation3], 0 }
   0x2   :  { %9 = vsyncpa [#allocation4], 0  ;;  %s15_s11 = sshll.u32 %s278_s0, 4  ;;  %s23_s14 = sshll.u32 %s279_s1, 4  ;;  %s16_s11 = int_to_ptr.vmem [resolvable:$true] %s15_s11  ;;  %s24_s14 = int_to_ptr.hbm [resolvable:$true] %s23_s14 }
   0x3   :  { %s243_s15 = smov [#allocation2]   ;;  %s244_s16 = smov [#allocation6]  }
   0x4   :  { %18 = dma.vmem_to_smem %s16_s11, 16, %s243_s15, [#allocation5]  }
   0x5   :  { %s25_s17 = sshll.u32 %s244_s16, 4  ;;  %s245_s18 = smov 128   ;;  %s26_s17 = int_to_ptr.vmem [resolvable:$true] %s25_s17 }
   0x6   :  { %s246_s19 = smov 8  }
   0x7   :  { %31 = dma.hbm_to_vmem [thread:$0]  %s24_s14, 8192, %s26_s17, [#allocation3], %s245_s18, %s245_s18, %s246_s19  }
   0x8   :  { %237 = dma.done.wait [#allocation5], 16  }
   0x9   :  { %238 = vsyncadd [#allocation5], 4294967280 }
   0xa   :  { %239 = dma.done.wait [#allocation3], 8192  }
   0xb   :  { %240 = vsyncadd [#allocation3], 4294959104 }
   0xc   :  { %40 = sfence }
   0xd   :  { %s41_s0 = sld [smem:[#allocation2]] }
   0xe   :  { %s157_s20 = sld [smem:[#allocation2 + $0x1]] }
   0xf   :  { %s158_s1 = sld [smem:[#allocation2 + $0x2]] }
  0x10   :  { %s159_s21 = sld [smem:[#allocation2 + $0x3]] }
  0x11   :  { %s160_s22 = sld [smem:[#allocation2 + $0x4]] }
  0x12   :  { %s161_s23 = sld [smem:[#allocation2 + $0x5]] }
  0x13   :  { %s162_s24 = sld [smem:[#allocation2 + $0x6]]  ;;  %s42_s25 = scalar_lea.vmem [#allocation6], %s41_s0 }
  0x14   :  { %v43_v0 = vld [vmem:[%s42_s25] sm:$0x1]  ;;  %s163_s26 = sld [smem:[#allocation2 + $0x7]]  ;;  %s47_s27 = scalar_lea.vmem [#allocation6], %s157_s20 }
  0x15   :  { %v44_v1 = vmul.f32 10.0, %v43_v0  ;;  %v48_v2 = vld [vmem:[%s47_s27] sm:$0x1]  ;;  %s164_s28 = sld [smem:[#allocation2 + $0x8]]  ;;  %s52_s29 = scalar_lea.vmem [#allocation6], %s158_s1 }
  0x16   :  { %v49_v3 = vmul.f32 10.0, %v48_v2  ;;  %v53_v4 = vld [vmem:[%s52_s29] sm:$0x1]  ;;  %s165_s30 = sld [smem:[#allocation2 + $0x9]]  ;;  %s57_s3 = scalar_lea.vmem [#allocation6], %s159_s21 }
  0x17   :  { %45 = vst [vmem:[#allocation7] sm:$0x1] %v44_v1  ;;  %v54_v5 = vmul.f32 10.0, %v53_v4  ;;  %v58_v6 = vld [vmem:[%s57_s3] sm:$0x1]  ;;  %s62_s4 = scalar_lea.vmem [#allocation6], %s160_s22 }
  0x18   :  { %50 = vst [vmem:[#allocation7 + $0x1] sm:$0x1] %v49_v3  ;;  %v59_v7 = vmul.f32 10.0, %v58_v6  ;;  %v63_v8 = vld [vmem:[%s62_s4] sm:$0x1]  ;;  %s67_s5 = scalar_lea.vmem [#allocation6], %s161_s23 }
  0x19   :  { %55 = vst [vmem:[#allocation7 + $0x2] sm:$0x1] %v54_v5  ;;  %v64_v9 = vmul.f32 10.0, %v63_v8  ;;  %v68_v10 = vld [vmem:[%s67_s5] sm:$0x1]  ;;  %s72_s6 = scalar_lea.vmem [#allocation6], %s162_s24 }
  0x1a   :  { %60 = vst [vmem:[#allocation7 + $0x3] sm:$0x1] %v59_v7  ;;  %v69_v11 = vmul.f32 10.0, %v68_v10  ;;  %v73_v12 = vld [vmem:[%s72_s6] sm:$0x1]  ;;  %s77_s7 = scalar_lea.vmem [#allocation6], %s163_s26 }
  0x1b   :  { %65 = vst [vmem:[#allocation7 + $0x4] sm:$0x1] %v64_v9  ;;  %v74_v13 = vmul.f32 10.0, %v73_v12  ;;  %v78_v14 = vld [vmem:[%s77_s7] sm:$0x1]  ;;  %s82_s8 = scalar_lea.vmem [#allocation6], %s164_s28 }
  0x1c   :  { %70 = vst [vmem:[#allocation7 + $0x5] sm:$0x1] %v69_v11  ;;  %v79_v15 = vmul.f32 10.0, %v78_v14  ;;  %v83_v16 = vld [vmem:[%s82_s8] sm:$0x1]  ;;  %s87_s9 = scalar_lea.vmem [#allocation6], %s165_s30 }
  0x1d   :  { %75 = vst [vmem:[#allocation7 + $0x6] sm:$0x1] %v74_v13  ;;  %v84_v17 = vmul.f32 10.0, %v83_v16  ;;  %v88_v18 = vld [vmem:[%s87_s9] sm:$0x1]  ;;  %s166_s10 = sld [smem:[#allocation2 + $0xa]] }
  0x1e   :  { %80 = vst [vmem:[#allocation7 + $0x7] sm:$0x1] %v79_v15  ;;  %v89_v19 = vmul.f32 10.0, %v88_v18  ;;  %s167_s11 = sld [smem:[#allocation2 + $0xb]]  ;;  %s247_s0 = smov [#allocation7]  }
  0x1f   :  { %85 = vst [vmem:[#allocation7 + $0x8] sm:$0x1] %v84_v17  ;;  %s168_s12 = sld [smem:[#allocation2 + $0xc]]  ;;  %s125_s20 = sshll.u32 %s247_s0, 4  ;;  %s126_s20 = int_to_ptr.vmem [resolvable:$true] %s125_s20 }
  0x20   :  { %90 = vst [vmem:[#allocation7 + $0x9] sm:$0x1] %v89_v19  ;;  %s169_s13 = sld [smem:[#allocation2 + $0xd]]  ;;  %s127_s23 = sshll.u32 %s280_s2, 4  ;;  %s128_s23 = int_to_ptr.hbm [resolvable:$true] %s127_s23 }
  0x21   :  { %s170_s14 = sld [smem:[#allocation2 + $0xe]] }
  0x22   :  { %s171_s15 = sld [smem:[#allocation2 + $0xf]] }
  0x23   :  { %s92_s16 = scalar_lea.vmem [#allocation6], %s166_s10 }
  0x24   :  { %v93_v20 = vld [vmem:[%s92_s16] sm:$0x1]  ;;  %s97_s17 = scalar_lea.vmem [#allocation6], %s167_s11 }
  0x25   :  { %v94_v21 = vmul.f32 10.0, %v93_v20  ;;  %v98_v22 = vld [vmem:[%s97_s17] sm:$0x1]  ;;  %s102_s1 = scalar_lea.vmem [#allocation6], %s168_s12 }
  0x26   :  { %v99_v23 = vmul.f32 10.0, %v98_v22  ;;  %v103_v24 = vld [vmem:[%s102_s1] sm:$0x1]  ;;  %s107_s24 = scalar_lea.vmem [#allocation6], %s169_s13 }
  0x27   :  { %95 = vst [vmem:[#allocation7 + $0xa] sm:$0x1] %v94_v21  ;;  %v104_v25 = vmul.f32 10.0, %v103_v24  ;;  %v108_v26 = vld [vmem:[%s107_s24] sm:$0x1]  ;;  %s112_s25 = scalar_lea.vmem [#allocation6], %s170_s14 }
  0x28   :  { %100 = vst [vmem:[#allocation7 + $0xb] sm:$0x1] %v99_v23  ;;  %v109_v27 = vmul.f32 10.0, %v108_v26  ;;  %v113_v28 = vld [vmem:[%s112_s25] sm:$0x1]  ;;  %s117_s26 = scalar_lea.vmem [#allocation6], %s171_s15 }
  0x29   :  { %105 = vst [vmem:[#allocation7 + $0xc] sm:$0x1] %v104_v25  ;;  %v114_v29 = vmul.f32 10.0, %v113_v28  ;;  %v118_v30 = vld [vmem:[%s117_s26] sm:$0x1] }
  0x2a   :  { %110 = vst [vmem:[#allocation7 + $0xd] sm:$0x1] %v109_v27  ;;  %v119_v31 = vmul.f32 10.0, %v118_v30 }
  0x2b   :  { %115 = vst [vmem:[#allocation7 + $0xe] sm:$0x1] %v114_v29 }
  0x2c   :  { %120 = vst [vmem:[#allocation7 + $0xf] sm:$0x1] %v119_v31 }
  0x2d   :  { %133 = dma.vmem_to_hbm [thread:$0]  %s126_s20, 256, %s128_s23, [#allocation4], %s245_s18, %s245_s18, %s246_s19  }
  0x2e   :  { %241 = dma.done.wait [#allocation4], 256  }
  0x2f   :  { %242 = vsyncadd [#allocation4], 4294967040 }
  0x30   :  { %138 = vsyncpa [#allocation3], 1 }
  0x31   :  { %139 = vsyncpa [#allocation4], 1 }
  0x32   :  { %140 = vsyncpa [#allocation5], 1 }

</bundles_post_ra>
